<compile_context>
chip_gen: v7x
topology: tpu7x:2x2x1
jax: 0.10.0
libtpu: 0.0.40
codegen_flags: <defaults>
</compile_context>

<pallas_src>
from collections import OrderedDict

import jax
import jax.numpy as jnp
from jax.experimental import pallas as pl
from jax.experimental.pallas import tpu as pltpu


# ----------------------------------------------------------------------------
# VMEM budgeting / tiling policy
# ----------------------------------------------------------------------------
def _vmem_capacity_bytes():
    try:
        return int(pltpu.get_tpu_info().vmem_capacity_bytes)
    except Exception:
        return 64 << 20  # conservative default (v7x physical VMEM)


_VMEM_CAP = _vmem_capacity_bytes()
# Double-buffered working-set budget: ~half of physical VMEM, capped so v5e/v6e
# (128 MiB) use at most ~48 MiB and v7x (64 MiB) at most ~32 MiB.
_VMEM_BUDGET = min(_VMEM_CAP // 2, 48 << 20)
_MAX_BATCH_BLOCK = 8   # bounds in-kernel static unrolling over the batch block


def _per_lane_bytes(cin, cout, b_tile, train):
    """Approx VMEM bytes per spatial lane of one grid step: double-buffered
    input/output blocks + accumulator scratch + a conservative allowance for
    live elementwise f32 temporaries."""
    io = (cin + cout) * 4 * 2 * b_tile            # x + (out | target), double-buffered
    acc = cout * 4 if train else 0                # VMEM vector accumulator (train)
    tmp = 4 * cout * 4                            # live (Cout, T) f32 temporaries
    return io + acc + tmp


def _pick_tiling(n, hw, cin, cout, train):
    """Choose (b_tile, tile_hw) so the per-step working set fits the VMEM budget
    while moving as many bytes per grid step as possible (kernel is HBM-bound;
    big tiles amortize the ~0.35us fixed per-step pipeline overhead)."""
    max_lanes = max(128, _VMEM_BUDGET // _per_lane_bytes(cin, cout, 1, train))
    if hw <= max_lanes:
        tile_hw = hw                              # full spatial extent per step
        # Small images: block several batch elements per step.
        max_b = min(_MAX_BATCH_BLOCK, max(1, max_lanes // max(hw, 1)))
        b_tile = 1
        for d in range(1, n + 1):
            if n % d == 0 and d <= max_b:
                b_tile = d
        return b_tile, tile_hw
    if hw % 128 == 0:
        k = hw // 128
        best = 1
        for d in range(1, k + 1):
            if k % d == 0 and d * 128 <= max_lanes:
                best = d
        return 1, best * 128
    # TODO(synk): ragged spatial extents larger than the budget fall back to a
    # single full-dim block (may exceed the budget); pad to a 128 multiple upstream.
    return 1, hw


def _vmem_limit_bytes(b_tile, tile_hw, cin, cout, train):
    footprint = _per_lane_bytes(cin, cout, b_tile, train) * tile_hw
    limit = max(footprint + (16 << 20), 32 << 20)
    return int(min(_VMEM_CAP - (8 << 20), limit))


# ----------------------------------------------------------------------------
# Pallas kernels
# ----------------------------------------------------------------------------
def _channel_mix_block(x, w, bias):
    """1x1-conv channel mix + bias + ReLU for a full (Cout, T) tile.

    x: (Cin, T) f32 with spatial on the lane axis; w: (Cout, Cin); bias: (Cout, 1),
    both VMEM-resident.  Computed as Cin broadcast FMAs over the full (Cout, T)
    block: full-vreg VPU work and one lane/sublane-dense result (no per-row
    strips, no masked stores).  Kept off the MXU so the contraction is exact f32
    (kernel is HBM-bound, so the MXU would not buy wall-clock).
    """
    cin = x.shape[0]
    acc = w[:, 0:1] * x[0:1, :]
    for c in range(1, cin):
        acc = acc + w[:, c:c + 1] * x[c:c + 1, :]
    return jnp.maximum(acc + bias, 0.0)


def _feat_kernel(w_ref, b_ref, x_ref, o_ref):
    # w_ref: VMEM (Cout, Cin); b_ref: VMEM (Cout, 1)
    # x_ref: VMEM (Bt, Cin, T); o_ref: VMEM (Bt, Cout, T)  (NCHW-native, lane-dense T)
    w = w_ref[...]
    bias = b_ref[...]
    for b in range(x_ref.shape[0]):               # Bt is small & static -> unrolled
        o_ref[b] = _channel_mix_block(x_ref[b], w, bias)


def _train_kernel(w_ref, b_ref, x_ref, t_ref, psum_ref, acc_ref):
    # Fused feature + squared-error partial sum for one batch block.
    # acc_ref: VMEM (Cout, T) vector accumulator (element-wise per step); the
    # cross-lane reduce happens exactly once per batch block, at finalize.
    # psum_ref: SMEM (1, 1) per-batch-block partial sum (own output block ->
    # the batch axis can be megacore-parallel on v7x).
    j = pl.program_id(1)

    @pl.when(j == 0)
    def _init():
        acc_ref[...] = jnp.zeros_like(acc_ref)

    w = w_ref[...]
    bias = b_ref[...]
    sq = None
    for b in range(x_ref.shape[0]):
        d = _channel_mix_block(x_ref[b], w, bias) - t_ref[b]
        sq = d * d if sq is None else sq + d * d
    acc_ref[...] += sq

    @pl.when(j == pl.num_programs(1) - 1)
    def _finalize():
        psum_ref[0, 0] = jnp.sum(acc_ref[...])


# ----------------------------------------------------------------------------
# pallas_call wrappers
# ----------------------------------------------------------------------------
def _extract_feat_pallas(x3d, w, b_col):
    """x3d: (N, Cin, HW) f32 -> (N, Cout, HW) f32, NCHW-native."""
    n, cin, hw = x3d.shape
    cout = w.shape[0]
    b_tile, tile_hw = _pick_tiling(n, hw, cin, cout, train=False)
    grid = (n // b_tile, hw // tile_hw)
    return pl.pallas_call(
        _feat_kernel,
        out_shape=jax.ShapeDtypeStruct((n, cout, hw), jnp.float32),
        grid=grid,
        in_specs=[
            pl.BlockSpec((cout, cin), lambda i, j: (0, 0)),    # w, VMEM-resident
            pl.BlockSpec((cout, 1), lambda i, j: (0, 0)),      # bias, VMEM-resident
            pl.BlockSpec((b_tile, cin, tile_hw), lambda i, j: (i, 0, j)),
        ],
        out_specs=pl.BlockSpec((b_tile, cout, tile_hw), lambda i, j: (i, 0, j)),
        compiler_params=pltpu.CompilerParams(
            dimension_semantics=("parallel", "parallel"),
            vmem_limit_bytes=_vmem_limit_bytes(b_tile, tile_hw, cin, cout, False)),
    )(w, b_col, x3d)


def _fused_train_loss_pallas(x3d, tgt3d, w, b_col):
    """Fused extract_feat + MSE(target) -> scalar loss. Feature map never hits HBM."""
    n, cin, hw = x3d.shape
    cout = w.shape[0]
    b_tile, tile_hw = _pick_tiling(n, hw, cin, cout, train=True)
    grid = (n // b_tile, hw // tile_hw)
    n_bblocks = grid[0]
    psums = pl.pallas_call(
        _train_kernel,
        out_shape=jax.ShapeDtypeStruct((n_bblocks, 1), jnp.float32),
        grid=grid,
        in_specs=[
            pl.BlockSpec((cout, cin), lambda i, j: (0, 0)),    # w
            pl.BlockSpec((cout, 1), lambda i, j: (0, 0)),      # bias
            pl.BlockSpec((b_tile, cin, tile_hw), lambda i, j: (i, 0, j)),
            pl.BlockSpec((b_tile, cout, tile_hw), lambda i, j: (i, 0, j)),
        ],
        out_specs=pl.BlockSpec((1, 1), lambda i, j: (i, 0),
                               memory_space=pltpu.MemorySpace.SMEM),
        scratch_shapes=[pltpu.VMEM((cout, tile_hw), jnp.float32)],
        compiler_params=pltpu.CompilerParams(
            # Batch axis parallel (per-block partial sums, megacore-safe on v7x);
            # spatial axis is the reduction -> arbitrary, last in grid.
            dimension_semantics=("parallel", "arbitrary"),
            vmem_limit_bytes=_vmem_limit_bytes(b_tile, tile_hw, cin, cout, True)),
    )(w, b_col, x3d, tgt3d)
    inv_count = 1.0 / float(n * cout * hw)
    return jnp.sum(psums) * jnp.float32(inv_count)


# ----------------------------------------------------------------------------
# BaseSimulator (JAX/Pallas version)
# ----------------------------------------------------------------------------
class BaseSimulatorPallas:
    """Mirrors BaseSimulator's forward dispatch; abstract hooks get a minimal
    concrete realization whose hot path runs in Pallas kernels."""

    def __init__(self, in_ch=4, out_ch=8, seed=0):
        k = jax.random.PRNGKey(seed)
        kw, kb = jax.random.split(k)
        # 1x1 conv weight stored as (Cout, Cin); bias as (Cout,)
        self.weight = (jax.random.normal(kw, (out_ch, in_ch), jnp.float32)
                       * (1.0 / jnp.sqrt(in_ch)))
        self.bias = jax.random.normal(kb, (out_ch,), jnp.float32) * 0.01
        self.in_ch = in_ch
        self.out_ch = out_ch
        self.neck = None
        self.head = None

    # ---- properties --------------------------------------------------------
    @property
    def with_neck(self):
        return getattr(self, 'neck', None) is not None

    @property
    def with_head(self):
        return getattr(self, 'head', None) is not None

    # ---- concrete realizations of the abstract hooks -----------------------
    def extract_feat(self, imgs):
        # imgs: NCHW float32 -> features NCHW float32 (no transposes anywhere).
        n_batch, c, h, w = imgs.shape
        assert c == self.in_ch
        x3d = imgs.reshape(n_batch, c, h * w)                 # free view
        feat = _extract_feat_pallas(x3d, self.weight,
                                    self.bias.reshape(self.out_ch, 1))
        return feat.reshape(n_batch, self.out_ch, h, w)

    def extract_feats(self, imgs):
        assert isinstance(imgs, list)
        for img in imgs:
            yield self.extract_feat(img)

    def forward_train(self, inputs, **kwargs):
        x = inputs['x']
        target = inputs['target']                             # NCHW, feature-map shape
        n_batch, c, h, w = x.shape
        assert c == self.in_ch and target.shape == (n_batch, self.out_ch, h, w)
        x3d = x.reshape(n_batch, c, h * w)                    # free views, no transposes
        t3d = target.reshape(n_batch, self.out_ch, h * w)
        loss_mse = _fused_train_loss_pallas(x3d, t3d, self.weight,
                                            self.bias.reshape(self.out_ch, 1))
        return {'loss_mse': loss_mse}

    def simple_test(self, img, **kwargs):
        if isinstance(img, dict):
            img = img['x']
        return self.extract_feat(img)

    def init_weights(self, pretrained=None):
        # TODO(synk): pretrained checkpoint loading not applicable; weights are synthetic.
        pass

    # ---- dispatch (faithful to the PyTorch module) --------------------------
    def forward_test(self, inputs, **kwargs):
        if isinstance(inputs, (jnp.ndarray, dict)):
            inputs = [inputs]
        if not isinstance(inputs, list):
            raise TypeError(f'inputs must be a list, but got {type(inputs)}')
        if len(inputs) == 1:
            return self.simple_test(inputs[0], **kwargs)
        raise NotImplementedError('aug_test has not been implemented')

    def forward(self, inputs, return_loss=True, **kwargs):
        if return_loss:
            return self.forward_train(inputs, **kwargs)
        return self.forward_test(inputs, **kwargs)

    def __call__(self, *args, **kwargs):
        return self.forward(*args, **kwargs)

    def _parse_losses(self, losses):
        log_vars = OrderedDict()
        for loss_name, loss_value in losses.items():
            if isinstance(loss_value, jnp.ndarray):
                log_vars[loss_name] = loss_value.mean()
            elif isinstance(loss_value, list):
                log_vars[loss_name] = sum(_l.mean() for _l in loss_value)
            elif isinstance(loss_value, dict):
                for name, value in loss_value.items():
                    log_vars[name] = value
            else:
                raise TypeError(f'{loss_name} is not a tensor or list of tensors')
        loss = sum(_v for _k, _v in log_vars.items() if 'loss' in _k)
        log_vars['loss'] = loss
        # TODO(synk): torch.distributed all_reduce omitted (single-host synthetic run).
        # Single device->host sync for all log values (instead of per-value float()).
        host_vals = jax.device_get(list(log_vars.values()))
        log_vars = OrderedDict((k, float(v)) for k, v in zip(log_vars.keys(), host_vals))
        return loss, log_vars

    def train_step(self, data, optimizer=None):
        losses = self(**data)
        loss, log_vars = self._parse_losses(losses)
        x = data['inputs'].get('x', None)
        if x is None:
            x = data['inputs'].get('output_mask', None)
        outputs = dict(loss=loss, log_vars=log_vars, num_samples=len(x))
        return outputs

    def val_step(self, data, optimizer=None):
        losses = self(**data)
        loss, log_vars = self._parse_losses(losses)
        outputs = dict(loss=loss, log_vars=log_vars,
                       num_samples=len(data['inputs']['x']))
        return outputs


# ----------------------------------------------------------------------------
# Main
# ----------------------------------------------------------------------------
if __name__ == "__main__":
    key = jax.random.PRNGKey(0)
    kx, kt = jax.random.split(key)

    N, C, H, W = 2, 4, 16, 16
    OUT_C = 8
    x = jax.random.normal(kx, (N, C, H, W), jnp.float32)
    target = jax.random.normal(kt, (N, OUT_C, H, W), jnp.float32)

    sim = BaseSimulatorPallas(in_ch=C, out_ch=OUT_C, seed=0)

    # training path (return_loss=True): single-nested inputs, fused feature+loss kernel
    outputs = sim.train_step({'inputs': {'x': x, 'target': target},
                              'return_loss': True})
    loss = outputs['loss']

    # test path (return_loss=False): double-nested (list of test-time augs)
    feat = sim.forward([{'x': x}], return_loss=False)

    jax.block_until_ready((loss, feat))

    # correctness check against a pure-JAX reference (exact-f32 elementwise math,
    # avoids MXU default-precision ambiguity in the reference itself)
    ref_feat = jnp.maximum(
        jnp.sum(sim.weight[None, :, :, None, None] * x[:, None, :, :, :], axis=2)
        + sim.bias[None, :, None, None], 0.0)
    ref_loss = jnp.mean((ref_feat - target) ** 2)

    assert feat.shape == (N, OUT_C, H, W)
    assert jnp.isfinite(loss)
    assert jnp.allclose(feat, ref_feat, rtol=1e-5, atol=1e-5)
    assert jnp.allclose(loss, ref_loss, rtol=1e-5, atol=1e-5)
    print("KERNEL_OK")
</pallas_src>

<mosaic_0001>
module attributes {stable_mosaic.version = 11 : i64} {
  func.func @_train_kernel(%arg0: i32, %arg1: i32, %arg2: memref<8x4xf32, #tpu.memory_space<vmem>>, %arg3: memref<8x1xf32, #tpu.memory_space<vmem>>, %arg4: memref<2x4x256xf32, #tpu.memory_space<vmem>>, %arg5: memref<2x8x256xf32, #tpu.memory_space<vmem>>, %arg6: memref<1x1xf32, #tpu.memory_space<smem>>, %arg7: memref<8x256xf32, #tpu.memory_space<vmem>>) attributes {dimension_semantics = [#tpu.dimension_semantics<parallel>, #tpu.dimension_semantics<arbitrary>], iteration_bounds = array<i64: 1, 1>, scalar_prefetch = 0 : i64, scratch_operands = 1 : i64, tpu.core_type = #tpu.core_type<tc>, window_params = [{pipeline_mode = #tpu.pipeline_mode<synchronous>, transform_indices = @transform_0, window_bounds = array<i64: 8, 4>}, {pipeline_mode = #tpu.pipeline_mode<synchronous>, transform_indices = @transform_1, window_bounds = array<i64: 8, 1>}, {transform_indices = @transform_2, window_bounds = array<i64: 2, 4, 256>}, {transform_indices = @transform_3, window_bounds = array<i64: 2, 8, 256>}, {transform_indices = @transform_4, window_bounds = array<i64: 1, 1>}]} {
    %c0_i32 = arith.constant 0 : i32
    %0 = arith.cmpi eq, %arg1, %c0_i32 : i32
    %1 = arith.extui %0 : i1 to i32
    %c0_i32_0 = arith.constant 0 : i32
    %2 = arith.cmpi ne, %1, %c0_i32_0 : i32
    scf.if %2 {
      %cst_22 = arith.constant 0.000000e+00 : f32
      %78 = vector.broadcast %cst_22 : f32 to vector<8x256xf32>
      %c0_23 = arith.constant 0 : index
      %c0_24 = arith.constant 0 : index
      %79 = vector.load %arg7[%c0_23, %c0_24] : memref<8x256xf32, #tpu.memory_space<vmem>>, vector<8x256xf32>
      tpu.vector_store %arg7[%c0_23, %c0_24], %78 {strides = array<i32>} : memref<8x256xf32, #tpu.memory_space<vmem>>, vector<8x256xf32>,
    } else {
    }
    %c0 = arith.constant 0 : index
    %c0_1 = arith.constant 0 : index
    %3 = vector.load %arg2[%c0, %c0_1] : memref<8x4xf32, #tpu.memory_space<vmem>>, vector<8x4xf32>
    %c0_2 = arith.constant 0 : index
    %c0_3 = arith.constant 0 : index
    %4 = vector.load %arg3[%c0_2, %c0_3] : memref<8x1xf32, #tpu.memory_space<vmem>>, vector<8x1xf32>
    %c0_4 = arith.constant 0 : index
    %c0_5 = arith.constant 0 : index
    %c0_6 = arith.constant 0 : index
    %5 = vector.load %arg4[%c0_4, %c0_5, %c0_6] : memref<2x4x256xf32, #tpu.memory_space<vmem>>, vector<1x4x256xf32>
    %6 = vector.shape_cast %5 : vector<1x4x256xf32> to vector<4x256xf32>
    %7 = vector.extract_strided_slice %3 {offsets = [0, 0], sizes = [8, 1], strides = [1, 1]} : vector<8x4xf32> to vector<8x1xf32>
    %8 = vector.extract_strided_slice %6 {offsets = [0, 0], sizes = [1, 256], strides = [1, 1]} : vector<4x256xf32> to vector<1x256xf32>
    %9 = vector.broadcast %7 : vector<8x1xf32> to vector<8x256xf32>
    %10 = vector.broadcast %8 : vector<1x256xf32> to vector<8x256xf32>
    %11 = arith.mulf %9, %10 : vector<8x256xf32>
    %12 = vector.extract_strided_slice %3 {offsets = [0, 1], sizes = [8, 1], strides = [1, 1]} : vector<8x4xf32> to vector<8x1xf32>
    %13 = vector.extract_strided_slice %6 {offsets = [1, 0], sizes = [1, 256], strides = [1, 1]} : vector<4x256xf32> to vector<1x256xf32>
    %14 = vector.broadcast %12 : vector<8x1xf32> to vector<8x256xf32>
    %15 = vector.broadcast %13 : vector<1x256xf32> to vector<8x256xf32>
    %16 = arith.mulf %14, %15 : vector<8x256xf32>
    %17 = arith.addf %11, %16 : vector<8x256xf32>
    %18 = vector.extract_strided_slice %3 {offsets = [0, 2], sizes = [8, 1], strides = [1, 1]} : vector<8x4xf32> to vector<8x1xf32>
    %19 = vector.extract_strided_slice %6 {offsets = [2, 0], sizes = [1, 256], strides = [1, 1]} : vector<4x256xf32> to vector<1x256xf32>
    %20 = vector.broadcast %18 : vector<8x1xf32> to vector<8x256xf32>
    %21 = vector.broadcast %19 : vector<1x256xf32> to vector<8x256xf32>
    %22 = arith.mulf %20, %21 : vector<8x256xf32>
    %23 = arith.addf %17, %22 : vector<8x256xf32>
    %24 = vector.extract_strided_slice %3 {offsets = [0, 3], sizes = [8, 1], strides = [1, 1]} : vector<8x4xf32> to vector<8x1xf32>
    %25 = vector.extract_strided_slice %6 {offsets = [3, 0], sizes = [1, 256], strides = [1, 1]} : vector<4x256xf32> to vector<1x256xf32>
    %26 = vector.broadcast %24 : vector<8x1xf32> to vector<8x256xf32>
    %27 = vector.broadcast %25 : vector<1x256xf32> to vector<8x256xf32>
    %28 = arith.mulf %26, %27 : vector<8x256xf32>
    %29 = arith.addf %23, %28 : vector<8x256xf32>
    %30 = vector.broadcast %4 : vector<8x1xf32> to vector<8x256xf32>
    %31 = arith.addf %29, %30 : vector<8x256xf32>
    %cst = arith.constant 0.000000e+00 : f32
    %32 = vector.broadcast %cst : f32 to vector<8x256xf32>
    %33 = arith.maximumf %31, %32 : vector<8x256xf32>
    %c0_7 = arith.constant 0 : index
    %c0_8 = arith.constant 0 : index
    %c0_9 = arith.constant 0 : index
    %34 = vector.load %arg5[%c0_7, %c0_8, %c0_9] : memref<2x8x256xf32, #tpu.memory_space<vmem>>, vector<1x8x256xf32>
    %35 = vector.shape_cast %34 : vector<1x8x256xf32> to vector<8x256xf32>
    %36 = arith.subf %33, %35 : vector<8x256xf32>
    %37 = arith.mulf %36, %36 : vector<8x256xf32>
    %c1 = arith.constant 1 : index
    %c0_10 = arith.constant 0 : index
    %c0_11 = arith.constant 0 : index
    %38 = vector.load %arg4[%c1, %c0_10, %c0_11] : memref<2x4x256xf32, #tpu.memory_space<vmem>>, vector<1x4x256xf32>
    %39 = vector.shape_cast %38 : vector<1x4x256xf32> to vector<4x256xf32>
    %40 = vector.extract_strided_slice %3 {offsets = [0, 0], sizes = [8, 1], strides = [1, 1]} : vector<8x4xf32> to vector<8x1xf32>
    %41 = vector.extract_strided_slice %39 {offsets = [0, 0], sizes = [1, 256], strides = [1, 1]} : vector<4x256xf32> to vector<1x256xf32>
    %42 = vector.broadcast %40 : vector<8x1xf32> to vector<8x256xf32>
    %43 = vector.broadcast %41 : vector<1x256xf32> to vector<8x256xf32>
    %44 = arith.mulf %42, %43 : vector<8x256xf32>
    %45 = vector.extract_strided_slice %3 {offsets = [0, 1], sizes = [8, 1], strides = [1, 1]} : vector<8x4xf32> to vector<8x1xf32>
    %46 = vector.extract_strided_slice %39 {offsets = [1, 0], sizes = [1, 256], strides = [1, 1]} : vector<4x256xf32> to vector<1x256xf32>
    %47 = vector.broadcast %45 : vector<8x1xf32> to vector<8x256xf32>
    %48 = vector.broadcast %46 : vector<1x256xf32> to vector<8x256xf32>
    %49 = arith.mulf %47, %48 : vector<8x256xf32>
    %50 = arith.addf %44, %49 : vector<8x256xf32>
    %51 = vector.extract_strided_slice %3 {offsets = [0, 2], sizes = [8, 1], strides = [1, 1]} : vector<8x4xf32> to vector<8x1xf32>
    %52 = vector.extract_strided_slice %39 {offsets = [2, 0], sizes = [1, 256], strides = [1, 1]} : vector<4x256xf32> to vector<1x256xf32>
    %53 = vector.broadcast %51 : vector<8x1xf32> to vector<8x256xf32>
    %54 = vector.broadcast %52 : vector<1x256xf32> to vector<8x256xf32>
    %55 = arith.mulf %53, %54 : vector<8x256xf32>
    %56 = arith.addf %50, %55 : vector<8x256xf32>
    %57 = vector.extract_strided_slice %3 {offsets = [0, 3], sizes = [8, 1], strides = [1, 1]} : vector<8x4xf32> to vector<8x1xf32>
    %58 = vector.extract_strided_slice %39 {offsets = [3, 0], sizes = [1, 256], strides = [1, 1]} : vector<4x256xf32> to vector<1x256xf32>
    %59 = vector.broadcast %57 : vector<8x1xf32> to vector<8x256xf32>
    %60 = vector.broadcast %58 : vector<1x256xf32> to vector<8x256xf32>
    %61 = arith.mulf %59, %60 : vector<8x256xf32>
    %62 = arith.addf %56, %61 : vector<8x256xf32>
    %63 = vector.broadcast %4 : vector<8x1xf32> to vector<8x256xf32>
    %64 = arith.addf %62, %63 : vector<8x256xf32>
    %cst_12 = arith.constant 0.000000e+00 : f32
    %65 = vector.broadcast %cst_12 : f32 to vector<8x256xf32>
    %66 = arith.maximumf %64, %65 : vector<8x256xf32>
    %c1_13 = arith.constant 1 : index
    %c0_14 = arith.constant 0 : index
    %c0_15 = arith.constant 0 : index
    %67 = vector.load %arg5[%c1_13, %c0_14, %c0_15] : memref<2x8x256xf32, #tpu.memory_space<vmem>>, vector<1x8x256xf32>
    %68 = vector.shape_cast %67 : vector<1x8x256xf32> to vector<8x256xf32>
    %69 = arith.subf %66, %68 : vector<8x256xf32>
    %70 = arith.mulf %69, %69 : vector<8x256xf32>
    %71 = arith.addf %37, %70 : vector<8x256xf32>
    %c0_16 = arith.constant 0 : index
    %c0_17 = arith.constant 0 : index
    %72 = vector.load %arg7[%c0_16, %c0_17] : memref<8x256xf32, #tpu.memory_space<vmem>>, vector<8x256xf32>
    %73 = arith.addf %72, %71 : vector<8x256xf32>
    %c0_18 = arith.constant 0 : index
    %c0_19 = arith.constant 0 : index
    %74 = vector.load %arg7[%c0_18, %c0_19] : memref<8x256xf32, #tpu.memory_space<vmem>>, vector<8x256xf32>
    tpu.vector_store %arg7[%c0_18, %c0_19], %73 {strides = array<i32>} : memref<8x256xf32, #tpu.memory_space<vmem>>, vector<8x256xf32>,
    %c0_i32_20 = arith.constant 0 : i32
    %75 = arith.cmpi eq, %arg1, %c0_i32_20 : i32
    %76 = arith.extui %75 : i1 to i32
    %c0_i32_21 = arith.constant 0 : i32
    %77 = arith.cmpi ne, %76, %c0_i32_21 : i32
    scf.if %77 {
      %c0_22 = arith.constant 0 : index
      %c0_23 = arith.constant 0 : index
      %78 = vector.load %arg7[%c0_22, %c0_23] : memref<8x256xf32, #tpu.memory_space<vmem>>, vector<8x256xf32>
      %79 = vector.shape_cast %78 : vector<8x256xf32> to vector<1x8x256xf32>
      %cst_24 = arith.constant dense<0.000000e+00> : vector<1xf32>
      %80 = vector.multi_reduction <add>, %79, %cst_24 [1, 2] : vector<1x8x256xf32> to vector<1xf32>
      %81 = vector.shape_cast %80 : vector<1xf32> to vector<1x1x1xf32>
      %82 = vector.extract %81[0, 0, 0] : f32 from vector<1x1x1xf32>
      %c0_25 = arith.constant 0 : index
      %c0_26 = arith.constant 0 : index
      %83 = memref.load %arg6[%c0_25, %c0_26] : memref<1x1xf32, #tpu.memory_space<smem>>
      memref.store %82, %arg6[%c0_25, %c0_26] : memref<1x1xf32, #tpu.memory_space<smem>>
    } else {
    }
    return
  }
  func.func @transform_0(%arg0: i32, %arg1: i32) -> (i32, i32) {
    %c0_i32 = arith.constant 0 : i32
    %c0_i32_0 = arith.constant 0 : i32
    %c0_i32_1 = arith.constant 0 : i32
    return %c0_i32, %c0_i32_0 : i32, i32
  }
  func.func @transform_1(%arg0: i32, %arg1: i32) -> (i32, i32) {
    %c0_i32 = arith.constant 0 : i32
    %c0_i32_0 = arith.constant 0 : i32
    %c0_i32_1 = arith.constant 0 : i32
    return %c0_i32, %c0_i32_0 : i32, i32
  }
  func.func @transform_2(%arg0: i32, %arg1: i32) -> (i32, i32, i32) {
    %c0_i32 = arith.constant 0 : i32
    %c0_i32_0 = arith.constant 0 : i32
    return %arg0, %c0_i32, %arg1 : i32, i32, i32
  }
  func.func @transform_3(%arg0: i32, %arg1: i32) -> (i32, i32, i32) {
    %c0_i32 = arith.constant 0 : i32
    %c0_i32_0 = arith.constant 0 : i32
    return %arg0, %c0_i32, %arg1 : i32, i32, i32
  }
  func.func @transform_4(%arg0: i32, %arg1: i32) -> (i32, i32) {
    %c0_i32 = arith.constant 0 : i32
    %c0_i32_0 = arith.constant 0 : i32
    return %arg0, %c0_i32 : i32, i32
  }
}

</mosaic_0001>

<bundles_post_ra>
// kernel: tpu_custom_call.1
= control target key start
LH: loop header
LB: loop body
LE: loop exit
PB: predicated region body
PF: predicated region fallthrough
CT: control target
= control target key end

     0   :  { %9 = vsyncpa [#allocation4], 0  ;;  %s428_s0 = inlined_call_operand.vmem [shape: f32[8,4], index: 0, kind: input, shape index: {}]   ;;  %s429_s1 = inlined_call_operand.vmem [shape: f32[8,1], index: 1, kind: input, shape index: {}]   ;;  %s430_s2 = inlined_call_operand.hbm [shape: f32[2,4,256], index: 2, kind: input, shape index: {}]   ;;  %s431_s3 = inlined_call_operand.vmem [shape: f32[2,8,256], index: 3, kind: input, shape index: {}]   ;;  %s432_s4 = inlined_call_operand.hbm [shape: f32[1,1], index: 4, kind: output, shape index: {}]  }
   0x1   :  { %10 = vsyncpa [#allocation5], 0  ;;  %s353_s15 = smov [#allocation3]   ;;  %s317_s19 = scalar_lea.hbm %s430_s2, 256 }
   0x2   :  { %s20_s16 = sshll.u32 %s353_s15, 4  ;;  %p318_p0 = scmp.ne.s32.totalorder %s430_s2, %s317_s19  ;;  %s21_s16 = int_to_ptr.vmem [resolvable:$true] %s20_s16 }
   0x3   :  { %p321_p1 = scmp.lt.u32.totalorder %s317_s19, %s430_s2 }
   0x5   :  { %p323_p2 = pnand %p321_p1, %p318_p0 }
   0x7   :  { %326 = shalt.err (!%p323_p2)
}
   0x8   :  { %s327_s24 = scalar_lea.vmem %s21_s16, 256  ;;  %p332_p4 = scmp.lt.s32.totalorder %s21_s16, %s21_s16 }
   0x9   :  { %p328_p3 = scmp.ne.s32.totalorder %s21_s16, %s327_s24  ;;  %p333_p5 = scmp.lt.s32.totalorder %s327_s24, %s327_s24 }
   0xb   :  { %p334_p6 = por %p333_p5, %p332_p4 }
   0xd   :  { %p335_p7 = pnand %p334_p6, %p328_p3 }
   0xf   :  { %338 = shalt.err (!%p335_p7)
}
  0x10   :  { %s354_s25 = smov 128   ;;  %s355_s26 = smov 8  }
  0x11   :  { %26 = dma.hbm_to_vmem [thread:$0]  %s430_s2, 256, %s21_s16, [#allocation4], %s354_s25, %s354_s25, %s355_s26  }
  0x12   :  { %349 = dma.done.wait [#allocation4], 256  }
  0x13   :  { %350 = vsyncadd [#allocation4], 4294967040  ;;  %v356_v0 = vmov 0   ;;  %v357_v1 = vmov 2   ;;  %v38_v2 = vld [vmem:[%s428_s0] sm:$0xff]  ;;  %v358_v3 = vmov 1   ;;  %v47_v6 = vlaneseq }
  0x14   :  { %311 = vset.pattern.permute.xlu0 %v356_v0  ;;  %313 = vset.pattern.permute.xlu1 %v357_v1  ;;  %v359_v4 = vmov 3   ;;  %v39_v5 = vld [vmem:[%s429_s1] sm:$0xff]  ;;  %v40_v10 = vld [vmem:[#allocation3] sm:$0xff]  ;;  %v161_v11 = vld [vmem:[#allocation3 + $0x8] sm:$0xff]  ;;  %s339_s14 = scalar_lea.hbm %s432_s4, 16 }
  0x15   :  { %43 = vperm.xlu0 %311, %v38_v2   ;;  %94 = vperm.xlu1 %313, %v38_v2   ;;  %v48_v7 = vshrl.u32 %v47_v6, 7  ;;  %p340_p8 = scmp.ne.s32.totalorder %s432_s4, %s339_s14  ;;  %p343_p9 = scmp.lt.u32.totalorder %s339_s14, %s432_s4 }
  0x17   :  { %v49_v8 = vsub.s32 0, %v48_v7  ;;  %v53_v9 = vsub.s32 4, %v48_v7  ;;  %v99_v12 = vsub.s32 2, %v48_v7  ;;  %v103_v13 = vsub.s32 6, %v48_v7  ;;  %p345_p10 = pnand %p343_p9, %p340_p8 }
  0x18   :  { %v73_v14 = vsub.s32 1, %v48_v7  ;;  %v77_v15 = vsub.s32 5, %v48_v7  ;;  %v125_v16 = vsub.s32 3, %v48_v7  ;;  %v129_v17 = vsub.s32 7, %v48_v7 }
  0x19   :  { %312 = vset.pattern.permute.xlu0 %v358_v3  ;;  %314 = vset.pattern.permute.xlu1 %v359_v4  ;;  %v50_v18 = vrot.slane %v40_v10, %v49_v8  ;;  %v54_v19 = vrot.slane %v40_v10, %v53_v9  ;;  %v166_v20 = vrot.slane %v161_v11, %v49_v8 }
  0x1a   :  { %68 = vperm.xlu0 %312, %v38_v2   ;;  %120 = vperm.xlu1 %314, %v38_v2   ;;  %v170_v21 = vrot.slane %v161_v11, %v53_v9  ;;  %v100_v22 = vrot.slane %v40_v10, %v99_v12  ;;  %v104_v23 = vrot.slane %v40_v10, %v103_v13 }
  0x1b   :  { %v208_v24 = vrot.slane %v161_v11, %v99_v12  ;;  %v212_v25 = vrot.slane %v161_v11, %v103_v13  ;;  %v74_v26 = vrot.slane %v40_v10, %v73_v14  ;;  %v78_v27 = vrot.slane %v40_v10, %v77_v15 }
  0x1c   :  { %v186_v28 = vrot.slane %v161_v11, %v73_v14  ;;  %v190_v29 = vrot.slane %v161_v11, %v77_v15  ;;  %v126_v30 = vrot.slane %v40_v10, %v125_v16  ;;  %v130_v31 = vrot.slane %v40_v10, %v129_v17 }
  0x1d   :  { %v230_v32 = vrot.slane %v161_v11, %v125_v16  ;;  %v234_v33 = vrot.slane %v161_v11, %v129_v17  ;;  %v60_v34 = vrot.slane %v50_v18, %v49_v8  ;;  %v64_v35 = vrot.slane %v54_v19, %v49_v8 }
  0x1e   :  { %315 = vset.pattern.permute.xlu1 %v356_v0  ;;  %316 = vset.pattern.permute.xlu0 %v356_v0  ;;  %v176_v36 = vrot.slane %v166_v20, %v49_v8  ;;  %v180_v37 = vrot.slane %v170_v21, %v49_v8  ;;  %v110_v40 = vrot.slane %v100_v22, %v99_v12 }
  0x1f   :  { %147 = vperm.xlu1 %315, %v39_v5   ;;  %v114_v41 = vrot.slane %v104_v23, %v99_v12  ;;  %v218_v42 = vrot.slane %v208_v24, %v99_v12  ;;  %v222_v43 = vrot.slane %v212_v25, %v99_v12  ;;  %v84_v44 = vrot.slane %v74_v26, %v73_v14  ;;  %v154_v23 = vld [vmem:[%s431_s3] sm:$0xff]  ;;  %v155_v24 = vld [vmem:[%s431_s3 + $0x8] sm:$0xff]  ;;  %v299_v25 = vld [vmem:[%s431_s3 + $0x10] sm:$0xff] }
  0x20   :  { %v88_v45 = vrot.slane %v78_v27, %v73_v14  ;;  %v196_v46 = vrot.slane %v186_v28, %v73_v14  ;;  %v200_v47 = vrot.slane %v190_v29, %v73_v14  ;;  %v136_v48 = vrot.slane %v126_v30, %v125_v16  ;;  %v300_v26 = vld [vmem:[%s431_s3 + $0x18] sm:$0xff] }
  0x21   :  { %v140_v49 = vrot.slane %v130_v31, %v125_v16  ;;  %v240_v50 = vrot.slane %v230_v32, %v125_v16  ;;  %v244_v51 = vrot.slane %v234_v33, %v125_v16 }
  0x94   :  { %v44_v38 = vpop.permute.xlu0 %43  ;;  %v95_v39 = vpop.permute.xlu1 %94 }
  0x95   :  { %v65_v52 = vmul.f32 %v60_v34, %v44_v38  ;;  %v66_v53 = vmul.f32 %v64_v35, %v44_v38  ;;  %v181_v54 = vmul.f32 %v176_v36, %v44_v38  ;;  %v182_v55 = vmul.f32 %v180_v37, %v44_v38 }
  0x96   :  { %v115_v56 = vmul.f32 %v110_v40, %v95_v39  ;;  %v116_v57 = vmul.f32 %v114_v41, %v95_v39  ;;  %v223_v58 = vmul.f32 %v218_v42, %v95_v39  ;;  %v224_v59 = vmul.f32 %v222_v43, %v95_v39 }
  0x99   :  { %v69_v60 = vpop.permute.xlu0 %68  ;;  %v121_v61 = vpop.permute.xlu1 %120 }
  0x9a   :  { %v89_v62 = vmul.f32 %v84_v44, %v69_v60  ;;  %v90_v63 = vmul.f32 %v88_v45, %v69_v60  ;;  %v201_v0 = vmul.f32 %v196_v46, %v69_v60  ;;  %v202_v1 = vmul.f32 %v200_v47, %v69_v60 }
  0x9b   :  { %v141_v2 = vmul.f32 %v136_v48, %v121_v61  ;;  %v142_v3 = vmul.f32 %v140_v49, %v121_v61  ;;  %v245_v4 = vmul.f32 %v240_v50, %v121_v61  ;;  %v246_v5 = vmul.f32 %v244_v51, %v121_v61 }
  0x9c   :  { %v91_v6 = vadd.f32 %v89_v62, %v65_v52  ;;  %v92_v7 = vadd.f32 %v90_v63, %v66_v53  ;;  %v203_v8 = vadd.f32 %v201_v0, %v181_v54  ;;  %v204_v9 = vadd.f32 %v202_v1, %v182_v55 }
  0x9e   :  { %v117_v10 = vadd.f32 %v115_v56, %v91_v6  ;;  %v118_v11 = vadd.f32 %v116_v57, %v92_v7  ;;  %v225_v12 = vadd.f32 %v223_v58, %v203_v8  ;;  %v226_v13 = vadd.f32 %v224_v59, %v204_v9  ;;  %v148_v14 = vpop.permute.xlu1 %147 }
  0xa0   :  { %v143_v15 = vadd.f32 %v141_v2, %v117_v10  ;;  %v144_v16 = vadd.f32 %v142_v3, %v118_v11  ;;  %v247_v17 = vadd.f32 %v245_v4, %v225_v12  ;;  %v248_v18 = vadd.f32 %v246_v5, %v226_v13 }
  0xa2   :  { %v150_v19 = vadd.f32 %v148_v14, %v143_v15  ;;  %v151_v20 = vadd.f32 %v148_v14, %v144_v16  ;;  %v249_v21 = vadd.f32 %v247_v17, %v148_v14  ;;  %v250_v22 = vadd.f32 %v248_v18, %v148_v14 }
  0xa4   :  { %v152_v27 = vmax.f32 %v150_v19, 0.0  ;;  %v153_v28 = vmax.f32 %v151_v20, 0.0  ;;  %v251_v29 = vmax.f32 %v249_v21, 0.0  ;;  %v252_v30 = vmax.f32 %v250_v22, 0.0 }
  0xa6   :  { %v156_v31 = vsub.f32 %v152_v27, %v154_v23  ;;  %v157_v32 = vsub.f32 %v153_v28, %v155_v24  ;;  %v256_v33 = vsub.f32 %v251_v29, %v299_v25  ;;  %v257_v34 = vsub.f32 %v252_v30, %v300_v26 }
  0xa8   :  { %v158_v35 = vmul.f32 %v156_v31, %v156_v31  ;;  %v159_v36 = vmul.f32 %v157_v32, %v157_v32  ;;  %v258_v37 = vmul.f32 %v256_v33, %v256_v33  ;;  %v259_v38 = vmul.f32 %v257_v34, %v257_v34 }
  0xaa   :  { %v260_v39 = vadd.f32 %v258_v37, %v158_v35  ;;  %v261_v40 = vadd.f32 %v259_v38, %v159_v36 }
  0xac   :  { %v273_v41 = vadd.f32 %v261_v40, %v260_v39 }
  0xae   :  { %274 = vadd.xlane.f32.xlu0 %v273_v41 }
 0x13b   :  { %v275_v42 = vpop.xlane.xlu0 %274 }
 0x13c   :  { %v276_v43 = vrot.slane %v275_v42, 4 }
 0x13e   :  { %v277_v44 = vadd.f32 %v276_v43, %v275_v42 }
 0x140   :  { %v278_v45 = vrot.slane %v277_v44, 2 }
 0x142   :  { %v279_v46 = vadd.f32 %v278_v45, %v277_v44 }
 0x144   :  { %v280_v47 = vrot.slane %v279_v46, 1 }
 0x146   :  { %v281_v48 = vadd.f32 %v280_v47, %v279_v46 }
 0x148   :  { %301 = vpush %v281_v48 }
 0x179   :  { %s302_s3 = spop %301 }
 0x17a   :  { %284 = sst [smem:[#allocation6]] %s302_s3 }
 0x17b   :  { %348 = shalt.err (!%p345_p10)
}
 0x17c   :  { %s360_s19 = smov [#allocation6]  }
 0x17d   :  { %292 = dma.smem_to_hbm %s360_s19, 16, %s432_s4, [#allocation5]  }
 0x17e   :  { %351 = dma.done.wait [#allocation5], 16  }
 0x17f   :  { %352 = vsyncadd [#allocation5], 4294967280 }
 0x180   :  { %296 = sfence }
 0x181   :  { %297 = vsyncpa [#allocation4], 1 }
 0x182   :  { %298 = vsyncpa [#allocation5], 1 }

</bundles_post_ra>
